<compile_context>
chip_gen: v7x
topology: tpu7x:2x2x1
jax: 0.10.0
libtpu: 0.0.40
codegen_flags: <defaults>
</compile_context>

<pallas_src>
import jax
import jax.numpy as jnp
import numpy as np
from jax.experimental import pallas as pl
from jax.experimental.pallas import tpu as pltpu

_VMEM_LIMIT_BYTES = 32 * 1024 * 1024   # <= physical/scoped VMEM on v5e, v6e and v7x
_VMEM_BUDGET_BYTES = 24 * 1024 * 1024  # headroom below the limit when picking tm
_DIMS = (300, 100, 30, 10, 1)          # fixed layer widths of BinaryClassification4


def _round_up(x, m):
    return ((x + m - 1) // m) * m


def _vmem_estimate(tm, num_features, x_itemsize, w_itemsize):
    """Rough VMEM footprint for a given row tile (double-buffered in/out + weights)."""
    x_buf = 2 * tm * num_features * x_itemsize
    o_buf = 2 * tm * 1 * 4
    w_elems = num_features * 300 + 300 * 100 + 100 * 30 + 30 * 10
    w_buf = 2 * (w_elems * w_itemsize + (300 + 100 + 30 + 10 + 10 + 1) * 4)
    act = tm * (304 + 104 + 32 + 16) * 4   # f32 intermediates, padded to lane tiles
    return x_buf + o_buf + w_buf + act


def _make_mlp_kernel(compute_dtype):
    def kernel(x_ref,
               w1_ref, b1_ref, w2_ref, b2_ref, w3_ref, b3_ref,
               w4_ref, b4_ref, w5_ref, b5_ref,
               o_ref):
        """Fused 5-layer MLP for one row tile: (relu o fc) x4 -> fc -> sigmoid."""
        x = x_ref[...].astype(compute_dtype)
        h = jnp.dot(x, w1_ref[...], preferred_element_type=jnp.float32) + b1_ref[...]
        h = jnp.maximum(h, 0.0)
        h = jnp.dot(h.astype(compute_dtype), w2_ref[...],
                    preferred_element_type=jnp.float32) + b2_ref[...]
        h = jnp.maximum(h, 0.0)
        h = jnp.dot(h.astype(compute_dtype), w3_ref[...],
                    preferred_element_type=jnp.float32) + b3_ref[...]
        h = jnp.maximum(h, 0.0)
        h = jnp.dot(h.astype(compute_dtype), w4_ref[...],
                    preferred_element_type=jnp.float32) + b4_ref[...]
        h = jnp.maximum(h, 0.0)
        # fc5 (10 -> 1): VPU multiply + lane reduction instead of a 1-lane-wide MXU op.
        z = jnp.sum(h * w5_ref[...], axis=-1, keepdims=True) + b5_ref[...]
        # sigmoid(z) = 0.5 * (tanh(z/2) + 1): one EUP op, no exp overflow.
        o_ref[...] = (0.5 * (jnp.tanh(0.5 * z) + 1.0)).astype(o_ref.dtype)
    return kernel


def binary_classification4_forward(x, params, *, row_tile=2048,
                                   compute_dtype=jnp.bfloat16):
    """x: (N, F) float32 or bfloat16 -> (N, 1) float32 probabilities."""
    N, F = x.shape
    w1, b1 = params["w1"], params["b1"]
    w2, b2 = params["w2"], params["b2"]
    w3, b3 = params["w3"], params["b3"]
    w4, b4 = params["w4"], params["b4"]
    w5, b5 = params["w5"], params["b5"]
    assert w1.shape == (F, 300) and w5.shape == (10, 1), (w1.shape, w5.shape)

    # ---- Row-tile selection -------------------------------------------------
    # Small batches: one full-extent block (no padding needed, minimum latency).
    # Larger batches: tile at up to `row_tile` rows, but always split into >=2 grid
    # steps so both v7x TensorCores get work; cap by the VMEM budget as well.
    if N <= 8:
        tm = N
    else:
        tm = min(row_tile, max(8, _round_up((N + 1) // 2, 8)))
        x_isz = jnp.dtype(x.dtype).itemsize
        w_isz = jnp.dtype(compute_dtype).itemsize
        while tm > 8 and _vmem_estimate(tm, F, x_isz, w_isz) > _VMEM_BUDGET_BYTES:
            tm = max(8, _round_up(tm // 2, 8))
    grid = (pl.cdiv(N, tm),)

    def resident(arr):
        # Full-array block, constant index map: stays in VMEM across grid steps.
        return pl.BlockSpec(arr.shape, lambda i: (0,) * arr.ndim)

    # MXU weights in compute dtype (bf16 by default); fc5 weight as an f32 row vector
    # for the VPU path; biases in f32 with shape (1, C) for clean broadcasts.
    w_mxu = [w.astype(compute_dtype) for w in (w1, w2, w3, w4)]
    w5_row = w5.reshape(1, -1).astype(jnp.float32)                    # (1, 10)
    biases = [b.reshape(1, -1).astype(jnp.float32) for b in (b1, b2, b3, b4, b5)]

    in_specs = [pl.BlockSpec((tm, F), lambda i: (i, 0))]
    operands = [x]                                                    # streamed as-is
    for w, b in zip(w_mxu, biases[:4]):
        in_specs += [resident(w), resident(b)]
        operands += [w, b]
    in_specs += [resident(w5_row), resident(biases[4])]
    operands += [w5_row, biases[4]]

    out = pl.pallas_call(
        _make_mlp_kernel(compute_dtype),
        out_shape=jax.ShapeDtypeStruct((N, 1), jnp.float32),
        grid=grid,
        in_specs=in_specs,
        out_specs=pl.BlockSpec((tm, 1), lambda i: (i, 0)),
        compiler_params=pltpu.CompilerParams(
            dimension_semantics=("parallel",),
            vmem_limit_bytes=_VMEM_LIMIT_BYTES),
    )(*operands)
    return out[:N]


def init_params(key, num_features):
    """Mimics nn.Linear defaults: U(-1/sqrt(fan_in), 1/sqrt(fan_in)) for W and b.

    Weights are stored as (in_features, out_features) so the kernel computes x @ W.
    """
    dims = [num_features] + list(_DIMS)
    ks = jax.random.split(key, 2 * (len(dims) - 1))
    params = {}
    for li in range(len(dims) - 1):
        fan_in, fan_out = dims[li], dims[li + 1]
        s = 1.0 / np.sqrt(fan_in)
        params[f"w{li + 1}"] = jax.random.uniform(
            ks[2 * li], (fan_in, fan_out), jnp.float32, -s, s)
        params[f"b{li + 1}"] = jax.random.uniform(
            ks[2 * li + 1], (fan_out,), jnp.float32, -s, s)
    return params


def reference_forward(x, p):
    """Pure-JAX f32 reference mirroring BinaryClassification4.forward."""
    h = jnp.maximum(x @ p["w1"] + p["b1"], 0.0)
    h = jnp.maximum(h @ p["w2"] + p["b2"], 0.0)
    h = jnp.maximum(h @ p["w3"] + p["b3"], 0.0)
    h = jnp.maximum(h @ p["w4"] + p["b4"], 0.0)
    z = h @ p["w5"] + p["b5"]
    return 1.0 / (1.0 + jnp.exp(-z))


if __name__ == "__main__":
    key = jax.random.PRNGKey(0)
    kx, kp = jax.random.split(key)

    num_features = 32
    batch = 8
    x = jax.random.normal(kx, (batch, num_features), dtype=jnp.float32)
    params = init_params(kp, num_features)

    ref = jax.block_until_ready(reference_forward(x, params))

    # f32 compute path: bit-tight vs the reference.
    out_f32 = jax.block_until_ready(
        binary_classification4_forward(x, params, compute_dtype=jnp.float32))
    assert out_f32.shape == (batch, 1), out_f32.shape
    np.testing.assert_allclose(np.asarray(out_f32), np.asarray(ref),
                               atol=1e-4, rtol=1e-4)

    # Default bf16-operand / f32-accumulate path; x streamed as bf16 by the caller.
    out_bf16 = jax.block_until_ready(
        binary_classification4_forward(x.astype(jnp.bfloat16), params))
    assert out_bf16.shape == (batch, 1), out_bf16.shape
    np.testing.assert_allclose(np.asarray(out_bf16), np.asarray(ref),
                               atol=1e-2, rtol=1e-2)

    print("KERNEL_OK")
</pallas_src>

<mosaic_0001>
module attributes {stable_mosaic.version = 11 : i64} {
  func.func @kernel(%arg0: i32, %arg1: memref<8x32xf32, #tpu.memory_space<vmem>>, %arg2: memref<32x300xf32, #tpu.memory_space<vmem>>, %arg3: memref<1x300xf32, #tpu.memory_space<vmem>>, %arg4: memref<300x100xf32, #tpu.memory_space<vmem>>, %arg5: memref<1x100xf32, #tpu.memory_space<vmem>>, %arg6: memref<100x30xf32, #tpu.memory_space<vmem>>, %arg7: memref<1x30xf32, #tpu.memory_space<vmem>>, %arg8: memref<30x10xf32, #tpu.memory_space<vmem>>, %arg9: memref<1x10xf32, #tpu.memory_space<vmem>>, %arg10: memref<1x10xf32, #tpu.memory_space<vmem>>, %arg11: memref<1x1xf32, #tpu.memory_space<vmem>>, %arg12: memref<8x1xf32, #tpu.memory_space<vmem>>) attributes {dimension_semantics = [#tpu.dimension_semantics<parallel>], iteration_bounds = array<i64: 1>, scalar_prefetch = 0 : i64, scratch_operands = 0 : i64, tpu.core_type = #tpu.core_type<tc>, window_params = [{transform_indices = @transform_0, window_bounds = array<i64: 8, 32>}, {pipeline_mode = #tpu.pipeline_mode<synchronous>, transform_indices = @transform_1, window_bounds = array<i64: 32, 300>}, {pipeline_mode = #tpu.pipeline_mode<synchronous>, transform_indices = @transform_2, window_bounds = array<i64: 1, 300>}, {pipeline_mode = #tpu.pipeline_mode<synchronous>, transform_indices = @transform_3, window_bounds = array<i64: 300, 100>}, {pipeline_mode = #tpu.pipeline_mode<synchronous>, transform_indices = @transform_4, window_bounds = array<i64: 1, 100>}, {pipeline_mode = #tpu.pipeline_mode<synchronous>, transform_indices = @transform_5, window_bounds = array<i64: 100, 30>}, {pipeline_mode = #tpu.pipeline_mode<synchronous>, transform_indices = @transform_6, window_bounds = array<i64: 1, 30>}, {pipeline_mode = #tpu.pipeline_mode<synchronous>, transform_indices = @transform_7, window_bounds = array<i64: 30, 10>}, {pipeline_mode = #tpu.pipeline_mode<synchronous>, transform_indices = @transform_8, window_bounds = array<i64: 1, 10>}, {pipeline_mode = #tpu.pipeline_mode<synchronous>, transform_indices = @transform_9, window_bounds = array<i64: 1, 10>}, {pipeline_mode = #tpu.pipeline_mode<synchronous>, transform_indices = @transform_10, window_bounds = array<i64: 1, 1>}, {transform_indices = @transform_11, window_bounds = array<i64: 8, 1>}]} {
    %c0 = arith.constant 0 : index
    %c0_0 = arith.constant 0 : index
    %0 = vector.load %arg1[%c0, %c0_0] : memref<8x32xf32, #tpu.memory_space<vmem>>, vector<8x32xf32>
    %c0_1 = arith.constant 0 : index
    %c0_2 = arith.constant 0 : index
    %1 = vector.load %arg2[%c0_1, %c0_2] : memref<32x300xf32, #tpu.memory_space<vmem>>, vector<32x300xf32>
    %cst = arith.constant dense<0.000000e+00> : vector<8x300xf32>
    %2 = tpu.matmul %0, %1, %cst {dimension_numbers = #tpu.dot_dimension_numbers<[1], [0], [0], [1], [0, 0, 1, 1], [], []>} : vector<8x32xf32>, vector<32x300xf32>, vector<8x300xf32> -> vector<8x300xf32>
    %c0_3 = arith.constant 0 : index
    %c0_4 = arith.constant 0 : index
    %3 = vector.load %arg3[%c0_3, %c0_4] : memref<1x300xf32, #tpu.memory_space<vmem>>, vector<1x300xf32>
    %4 = vector.broadcast %3 : vector<1x300xf32> to vector<8x300xf32>
    %5 = arith.addf %2, %4 : vector<8x300xf32>
    %cst_5 = arith.constant 0.000000e+00 : f32
    %6 = vector.broadcast %cst_5 : f32 to vector<8x300xf32>
    %7 = arith.maximumf %5, %6 : vector<8x300xf32>
    %c0_6 = arith.constant 0 : index
    %c0_7 = arith.constant 0 : index
    %8 = vector.load %arg4[%c0_6, %c0_7] : memref<300x100xf32, #tpu.memory_space<vmem>>, vector<300x100xf32>
    %cst_8 = arith.constant dense<0.000000e+00> : vector<8x100xf32>
    %9 = tpu.matmul %7, %8, %cst_8 {dimension_numbers = #tpu.dot_dimension_numbers<[1], [0], [0], [1], [0, 0, 1, 1], [], []>} : vector<8x300xf32>, vector<300x100xf32>, vector<8x100xf32> -> vector<8x100xf32>
    %c0_9 = arith.constant 0 : index
    %c0_10 = arith.constant 0 : index
    %10 = vector.load %arg5[%c0_9, %c0_10] : memref<1x100xf32, #tpu.memory_space<vmem>>, vector<1x100xf32>
    %11 = vector.broadcast %10 : vector<1x100xf32> to vector<8x100xf32>
    %12 = arith.addf %9, %11 : vector<8x100xf32>
    %cst_11 = arith.constant 0.000000e+00 : f32
    %13 = vector.broadcast %cst_11 : f32 to vector<8x100xf32>
    %14 = arith.maximumf %12, %13 : vector<8x100xf32>
    %c0_12 = arith.constant 0 : index
    %c0_13 = arith.constant 0 : index
    %15 = vector.load %arg6[%c0_12, %c0_13] : memref<100x30xf32, #tpu.memory_space<vmem>>, vector<100x30xf32>
    %cst_14 = arith.constant dense<0.000000e+00> : vector<8x30xf32>
    %16 = tpu.matmul %14, %15, %cst_14 {dimension_numbers = #tpu.dot_dimension_numbers<[1], [0], [0], [1], [0, 0, 1, 1], [], []>} : vector<8x100xf32>, vector<100x30xf32>, vector<8x30xf32> -> vector<8x30xf32>
    %c0_15 = arith.constant 0 : index
    %c0_16 = arith.constant 0 : index
    %17 = vector.load %arg7[%c0_15, %c0_16] : memref<1x30xf32, #tpu.memory_space<vmem>>, vector<1x30xf32>
    %18 = vector.broadcast %17 : vector<1x30xf32> to vector<8x30xf32>
    %19 = arith.addf %16, %18 : vector<8x30xf32>
    %cst_17 = arith.constant 0.000000e+00 : f32
    %20 = vector.broadcast %cst_17 : f32 to vector<8x30xf32>
    %21 = arith.maximumf %19, %20 : vector<8x30xf32>
    %c0_18 = arith.constant 0 : index
    %c0_19 = arith.constant 0 : index
    %22 = vector.load %arg8[%c0_18, %c0_19] : memref<30x10xf32, #tpu.memory_space<vmem>>, vector<30x10xf32>
    %cst_20 = arith.constant dense<0.000000e+00> : vector<8x10xf32>
    %23 = tpu.matmul %21, %22, %cst_20 {dimension_numbers = #tpu.dot_dimension_numbers<[1], [0], [0], [1], [0, 0, 1, 1], [], []>} : vector<8x30xf32>, vector<30x10xf32>, vector<8x10xf32> -> vector<8x10xf32>
    %c0_21 = arith.constant 0 : index
    %c0_22 = arith.constant 0 : index
    %24 = vector.load %arg9[%c0_21, %c0_22] : memref<1x10xf32, #tpu.memory_space<vmem>>, vector<1x10xf32>
    %25 = vector.broadcast %24 : vector<1x10xf32> to vector<8x10xf32>
    %26 = arith.addf %23, %25 : vector<8x10xf32>
    %cst_23 = arith.constant 0.000000e+00 : f32
    %27 = vector.broadcast %cst_23 : f32 to vector<8x10xf32>
    %28 = arith.maximumf %26, %27 : vector<8x10xf32>
    %c0_24 = arith.constant 0 : index
    %c0_25 = arith.constant 0 : index
    %29 = vector.load %arg10[%c0_24, %c0_25] : memref<1x10xf32, #tpu.memory_space<vmem>>, vector<1x10xf32>
    %30 = vector.broadcast %29 : vector<1x10xf32> to vector<8x10xf32>
    %31 = arith.mulf %28, %30 : vector<8x10xf32>
    %cst_26 = arith.constant dense<0.000000e+00> : vector<8xf32>
    %32 = vector.multi_reduction <add>, %31, %cst_26 [1] : vector<8x10xf32> to vector<8xf32>
    %33 = vector.shape_cast %32 : vector<8xf32> to vector<8x1xf32>
    %c0_27 = arith.constant 0 : index
    %c0_28 = arith.constant 0 : index
    %34 = vector.load %arg11[%c0_27, %c0_28] : memref<1x1xf32, #tpu.memory_space<vmem>>, vector<1x1xf32>
    %35 = vector.broadcast %34 : vector<1x1xf32> to vector<8x1xf32>
    %36 = arith.addf %33, %35 : vector<8x1xf32>
    %cst_29 = arith.constant 5.000000e-01 : f32
    %37 = vector.broadcast %cst_29 : f32 to vector<8x1xf32>
    %38 = arith.mulf %37, %36 : vector<8x1xf32>
    %39 = math.tanh %38 : vector<8x1xf32>
    %cst_30 = arith.constant 1.000000e+00 : f32
    %40 = vector.broadcast %cst_30 : f32 to vector<8x1xf32>
    %41 = arith.addf %39, %40 : vector<8x1xf32>
    %cst_31 = arith.constant 5.000000e-01 : f32
    %42 = vector.broadcast %cst_31 : f32 to vector<8x1xf32>
    %43 = arith.mulf %42, %41 : vector<8x1xf32>
    %c0_32 = arith.constant 0 : index
    %c0_33 = arith.constant 0 : index
    %44 = vector.load %arg12[%c0_32, %c0_33] : memref<8x1xf32, #tpu.memory_space<vmem>>, vector<8x1xf32>
    tpu.vector_store %arg12[%c0_32, %c0_33], %43 {strides = array<i32>} : memref<8x1xf32, #tpu.memory_space<vmem>>, vector<8x1xf32>,
    return
  }
  func.func @transform_0(%arg0: i32) -> (i32, i32) {
    %c0_i32 = arith.constant 0 : i32
    %c0_i32_0 = arith.constant 0 : i32
    return %arg0, %c0_i32 : i32, i32
  }
  func.func @transform_1(%arg0: i32) -> (i32, i32) {
    %c0_i32 = arith.constant 0 : i32
    %c0_i32_0 = arith.constant 0 : i32
    %c0_i32_1 = arith.constant 0 : i32
    return %c0_i32, %c0_i32_0 : i32, i32
  }
  func.func @transform_2(%arg0: i32) -> (i32, i32) {
    %c0_i32 = arith.constant 0 : i32
    %c0_i32_0 = arith.constant 0 : i32
    %c0_i32_1 = arith.constant 0 : i32
    return %c0_i32, %c0_i32_0 : i32, i32
  }
  func.func @transform_3(%arg0: i32) -> (i32, i32) {
    %c0_i32 = arith.constant 0 : i32
    %c0_i32_0 = arith.constant 0 : i32
    %c0_i32_1 = arith.constant 0 : i32
    return %c0_i32, %c0_i32_0 : i32, i32
  }
  func.func @transform_4(%arg0: i32) -> (i32, i32) {
    %c0_i32 = arith.constant 0 : i32
    %c0_i32_0 = arith.constant 0 : i32
    %c0_i32_1 = arith.constant 0 : i32
    return %c0_i32, %c0_i32_0 : i32, i32
  }
  func.func @transform_5(%arg0: i32) -> (i32, i32) {
    %c0_i32 = arith.constant 0 : i32
    %c0_i32_0 = arith.constant 0 : i32
    %c0_i32_1 = arith.constant 0 : i32
    return %c0_i32, %c0_i32_0 : i32, i32
  }
  func.func @transform_6(%arg0: i32) -> (i32, i32) {
    %c0_i32 = arith.constant 0 : i32
    %c0_i32_0 = arith.constant 0 : i32
    %c0_i32_1 = arith.constant 0 : i32
    return %c0_i32, %c0_i32_0 : i32, i32
  }
  func.func @transform_7(%arg0: i32) -> (i32, i32) {
    %c0_i32 = arith.constant 0 : i32
    %c0_i32_0 = arith.constant 0 : i32
    %c0_i32_1 = arith.constant 0 : i32
    return %c0_i32, %c0_i32_0 : i32, i32
  }
  func.func @transform_8(%arg0: i32) -> (i32, i32) {
    %c0_i32 = arith.constant 0 : i32
    %c0_i32_0 = arith.constant 0 : i32
    %c0_i32_1 = arith.constant 0 : i32
    return %c0_i32, %c0_i32_0 : i32, i32
  }
  func.func @transform_9(%arg0: i32) -> (i32, i32) {
    %c0_i32 = arith.constant 0 : i32
    %c0_i32_0 = arith.constant 0 : i32
    %c0_i32_1 = arith.constant 0 : i32
    return %c0_i32, %c0_i32_0 : i32, i32
  }
  func.func @transform_10(%arg0: i32) -> (i32, i32) {
    %c0_i32 = arith.constant 0 : i32
    %c0_i32_0 = arith.constant 0 : i32
    %c0_i32_1 = arith.constant 0 : i32
    return %c0_i32, %c0_i32_0 : i32, i32
  }
  func.func @transform_11(%arg0: i32) -> (i32, i32) {
    %c0_i32 = arith.constant 0 : i32
    %c0_i32_0 = arith.constant 0 : i32
    return %arg0, %c0_i32 : i32, i32
  }
}

</mosaic_0001>

<bundles_post_ra>
// kernel: tpu_custom_call.1
= control target key start
LH: loop header
LB: loop body
LE: loop exit
PB: predicated region body
PF: predicated region fallthrough
CT: control target
= control target key end

     0   :  { %s1121_s0 = inlined_call_operand.vmem [shape: f32[8,32], index: 0, kind: input, shape index: {}]   ;;  %s1122_s1 = inlined_call_operand.vmem [shape: f32[32,300], index: 1, kind: input, shape index: {}]   ;;  %s1123_s2 = inlined_call_operand.vmem [shape: f32[1,300], index: 2, kind: input, shape index: {}]   ;;  %s1124_s3 = inlined_call_operand.hbm [shape: f32[300,100], index: 3, kind: input, shape index: {}]   ;;  %s1125_s4 = inlined_call_operand.vmem [shape: f32[1,100], index: 4, kind: input, shape index: {}]   ;;  %s1126_s5 = inlined_call_operand.vmem [shape: f32[100,30], index: 5, kind: input, shape index: {}]   ;;  %s1127_s6 = inlined_call_operand.vmem [shape: f32[1,30], index: 6, kind: input, shape index: {}]   ;;  %s1128_s7 = inlined_call_operand.vmem [shape: f32[30,10], index: 7, kind: input, shape index: {}]   ;;  %s1129_s8 = inlined_call_operand.vmem [shape: f32[1,10], index: 8, kind: input, shape index: {}]   ;;  %s1130_s9 = inlined_call_operand.vmem [shape: f32[1,10], index: 9, kind: input, shape index: {}]   ;;  %s1131_s10 = inlined_call_operand.<no memory space> [shape: f32[1,1], index: 10, kind: input, shape index: {}]   ;;  %s1132_s11 = inlined_call_operand.vmem [shape: f32[8,1], index: 11, kind: output, shape index: {}]  }
   0x1   :  { %v16_v0 = vstv %s1131_s10 }
   0x2   :  { %17 = vst [vmem:[#allocation2] sm:$0x1] %v16_v0 }
   0x3   :  { %18 = vsyncpa [#allocation4], 0  ;;  %s904_s19 = smov [#allocation3]   ;;  %s880_s23 = scalar_lea.hbm %s1124_s3, 4864 }
   0x4   :  { %s30_s20 = sshll.u32 %s904_s19, 4  ;;  %p881_p0 = scmp.ne.s32.totalorder %s1124_s3, %s880_s23  ;;  %s31_s20 = int_to_ptr.vmem [resolvable:$true] %s30_s20 }
   0x5   :  { %p884_p1 = scmp.lt.u32.totalorder %s880_s23, %s1124_s3 }
   0x7   :  { %p886_p2 = pnand %p884_p1, %p881_p0 }
   0x9   :  { %889 = shalt.err (!%p886_p2)
}
   0xa   :  { %s890_s10 = scalar_lea.vmem %s31_s20, 4864  ;;  %p895_p4 = scmp.lt.s32.totalorder %s31_s20, %s31_s20 }
   0xb   :  { %p891_p3 = scmp.ne.s32.totalorder %s31_s20, %s890_s10  ;;  %p896_p5 = scmp.lt.s32.totalorder %s890_s10, %s890_s10 }
   0xd   :  { %p897_p6 = por %p896_p5, %p895_p4 }
   0xf   :  { %p898_p7 = pnand %p897_p6, %p891_p3 }
  0x11   :  { %901 = shalt.err (!%p898_p7)
}
  0x12   :  { %s905_s28 = smov 128   ;;  %s906_s29 = smov 8  }
  0x13   :  { %36 = dma.hbm_to_vmem [thread:$0]  %s1124_s3, 4864, %s31_s20, [#allocation4], %s905_s28, %s905_s28, %s906_s29  }
  0x14   :  { %902 = dma.done.wait [#allocation4], 4864  }
  0x15   :  { %903 = vsyncadd [#allocation4], 4294962432  ;;  %v907_v1 = vmov 0.0|0.0   ;;  %v908_v2 = vmov 0.0   ;;  %vm909_vm0 = vmmov 0   ;;  %v56_v3 = vld [vmem:[%s1122_s1 + $0x8] sm:$0xff] }
  0x16   :  { %798 = vmatprep.subr.bf16.mxu1 %v907_v1  ;;  %152 = vmatprep.mubr.f32.mxu0 %v908_v2  ;;  %v59_v4 = vld [vmem:[%s1122_s1 + $0x20] sm:$0xff]  ;;  %v58_v7 = vld [vmem:[%s1122_s1 + $0x18] sm:$0xff]  ;;  %v65_v9 = vld [vmem:[%s1122_s1 + $0x50] sm:$0xff]  ;;  %vm84_vm1 = vcmask 261120   ;;  %vm281_vm2 = vcmask 1043456   ;;  %vm910_vm3 = vmmov 1  }
  0x17   :  { %732 = vmatprep.mubr.msk.f32.mxu1 %vm909_vm0, %v908_v2  ;;  %v55_v5 = vld [vmem:[%s1122_s1] sm:$0xff]  ;;  %v790_v6 = vpack.c.bf16 %v59_v4, %v56_v3  ;;  %v62_v8 = vld [vmem:[%s1122_s1 + $0x38] sm:$0xff]  ;;  %v61_v12 = vld [vmem:[%s1122_s1 + $0x30] sm:$0xff]  ;;  %vm277_vm5 = vcmask 359424   ;;  %vm446_vm6 = vcmask 818176   ;;  %vm539_vm7 = vcmask 1045504  }
  0x18   :  { %v792_v10 = vpack.c.bf16 %v58_v7, %v55_v5  ;;  %v794_v11 = vpack.c.bf16 %v65_v9, %v62_v8  ;;  %v64_v13 = vld [vmem:[%s1122_s1 + $0x48] sm:$0xff]  ;;  %v57_v14 = vld [vmem:[%s1122_s1 + $0x10] sm:$0xff]  ;;  %v63_v16 = vld [vmem:[%s1122_s1 + $0x40] sm:$0xff]  ;;  %vm535_vm9 = vcmask 244736   ;;  %vm622_vm10 = vcmask 80896  }
  0x19   :  { %791 = vmatprep.subr.bf16.mxu0 %v790_v6  ;;  %v60_v15 = vld [vmem:[%s1122_s1 + $0x28] sm:$0xff]  ;;  %v796_v17 = vpack.c.bf16 %v64_v13, %v61_v12  ;;  %v66_v19 = vld [vmem:[%s1122_s1 + $0x58] sm:$0xff]  ;;  %v54_v28 = vld [vmem:[%s1121_s0] sm:$0xff]  ;;  %vm638_vm11 = vcmask 7168  }
  0x1a   :  { %793 = vmatpush1.bf16.msra.mxu0 %v792_v10  ;;  %v799_v18 = vpack.c.bf16 %v60_v15, %v57_v14  ;;  %v248_v20 = vld [vmem:[#allocation3 + $0x80] sm:$0xff]  ;;  %v249_v21 = vld [vmem:[#allocation3 + $0x88] sm:$0xff]  ;;  %v802_v25 = vpack.c.bf16 %v66_v19, %v63_v16  ;;  %v250_v26 = vld [vmem:[#allocation3 + $0x90] sm:$0xff] }
  0x1b   :  { %795 = vmatprep.subr.bf16.mxu0 %v794_v11  ;;  %v804_v22 = vpack.c.bf16 %v249_v21, %v248_v20  ;;  %v232_v23 = vld [vmem:[#allocation3] sm:$0xff]  ;;  %v233_v24 = vld [vmem:[#allocation3 + $0x8] sm:$0xff]  ;;  %v251_v27 = vld [vmem:[#allocation3 + $0x98] sm:$0xff] }
  0x1c   :  { %800 = vmatpush3.bf16.msra.mxu1 %v799_v18  ;;  %v806_v29 = vpack.c.bf16 %v233_v24, %v232_v23  ;;  %v808_v30 = vpack.c.bf16 %v251_v27, %v250_v26  ;;  %v234_v31 = vld [vmem:[#allocation3 + $0x10] sm:$0xff]  ;;  %v235_v32 = vld [vmem:[#allocation3 + $0x18] sm:$0xff]  ;;  %v252_v33 = vld [vmem:[#allocation3 + $0xa0] sm:$0xff] }
  0x1d   :  { %801 = vmatprep.subr.bf16.mxu1 %v907_v1  ;;  %v253_v34 = vld [vmem:[#allocation3 + $0xa8] sm:$0xff]  ;;  %v810_v35 = vpack.c.bf16 %v235_v32, %v234_v31  ;;  %v236_v37 = vld [vmem:[#allocation3 + $0x20] sm:$0xff]  ;;  %v254_v39 = vld [vmem:[#allocation3 + $0xb0] sm:$0xff] }
  0x1e   :  { %797 = vmatpush1.bf16.msra.mxu0 %v796_v17  ;;  %v812_v36 = vpack.c.bf16 %v253_v34, %v252_v33  ;;  %v237_v38 = vld [vmem:[#allocation3 + $0x28] sm:$0xff]  ;;  %v255_v40 = vld [vmem:[#allocation3 + $0xb8] sm:$0xff]  ;;  %v238_v43 = vld [vmem:[#allocation3 + $0x30] sm:$0xff]  ;;  %v69_v17 = vlaneseq }
  0x1f   :  { %805 = vmatprep.subr.bf16.mxu0 %v804_v22  ;;  %v814_v41 = vpack.c.bf16 %v237_v38, %v236_v37  ;;  %v816_v42 = vpack.c.bf16 %v255_v40, %v254_v39  ;;  %v239_v44 = vld [vmem:[#allocation3 + $0x38] sm:$0xff]  ;;  %v256_v45 = vld [vmem:[#allocation3 + $0xc0] sm:$0xff]  ;;  %v257_v46 = vld [vmem:[#allocation3 + $0xc8] sm:$0xff] }
  0x20   :  { %803 = vmatpush3.bf16.msra.mxu1 %v802_v25  ;;  %v818_v47 = vpack.c.bf16 %v239_v44, %v238_v43  ;;  %v820_v48 = vpack.c.bf16 %v257_v46, %v256_v45  ;;  %v240_v49 = vld [vmem:[#allocation3 + $0x40] sm:$0xff]  ;;  %v241_v50 = vld [vmem:[#allocation3 + $0x48] sm:$0xff]  ;;  %v258_v51 = vld [vmem:[#allocation3 + $0xd0] sm:$0xff]  ;;  %v70_v18 = vshrl.u32 %v69_v17, 7 }
  0x21   :  { %645 = vmatmul.mubr.msk.f32.vlgmr.msra.gmra.mrb[0].mxu0 %vm84_vm1, %v54_v28  ;;  %836 = vmatprep.subr.bf16.mxu1 %v907_v1  ;;  %v259_v52 = vld [vmem:[#allocation3 + $0xd8] sm:$0xff]  ;;  %v822_v53 = vpack.c.bf16 %v241_v50, %v240_v49  ;;  %v242_v55 = vld [vmem:[#allocation3 + $0x50] sm:$0xff]  ;;  %v260_v57 = vld [vmem:[#allocation3 + $0xe0] sm:$0xff] }
  0x22   :  { %807 = vmatpush3.bf16.msra.mxu0 %v806_v29  ;;  %v824_v54 = vpack.c.bf16 %v259_v52, %v258_v51  ;;  %v243_v56 = vld [vmem:[#allocation3 + $0x58] sm:$0xff]  ;;  %v261_v58 = vld [vmem:[#allocation3 + $0xe8] sm:$0xff]  ;;  %v244_v61 = vld [vmem:[#allocation3 + $0x60] sm:$0xff]  ;;  %v71_v19 = vsub.s32 0, %v70_v18  ;;  %v75_v21 = vsub.s32 1, %v70_v18  ;;  %v79_v22 = vsub.s32 2, %v70_v18 }
  0x23   :  { %733 = vmatmul.mubr.msk.f32.vlgmr.msra.gmra.mrb[0].mxu1 %vm84_vm1, %v54_v28  ;;  %809 = vmatprep.subr.bf16.mxu0 %v808_v30  ;;  %v826_v59 = vpack.c.bf16 %v243_v56, %v242_v55  ;;  %v828_v60 = vpack.c.bf16 %v261_v58, %v260_v57  ;;  %v245_v62 = vld [vmem:[#allocation3 + $0x68] sm:$0xff]  ;;  %v264_v63 = vld [vmem:[#allocation3 + $0x100] sm:$0xff]  ;;  %v262_v5 = vld [vmem:[#allocation3 + $0xf0] sm:$0xff] }
  0x24   :  { %747 = vmatprep.mubr.msk.f32.mxu1 %vm909_vm0, %v908_v2  ;;  %v830_v0 = vpack.c.bf16 %v245_v62, %v244_v61  ;;  %v265_v3 = vld [vmem:[#allocation3 + $0x108] sm:$0xff]  ;;  %v263_v6 = vld [vmem:[#allocation3 + $0xf8] sm:$0xff]  ;;  %v246_v8 = vld [vmem:[#allocation3 + $0x70] sm:$0xff] }
  0x25   :  { %v837_v4 = vpack.c.bf16 %v265_v3, %v264_v63  ;;  %v832_v7 = vpack.c.bf16 %v263_v6, %v262_v5  ;;  %v247_v9 = vld [vmem:[#allocation3 + $0x78] sm:$0xff]  ;;  %v266_v10 = vld [vmem:[#allocation3 + $0x110] sm:$0xff]  ;;  %v268_v14 = vld [vmem:[#allocation3 + $0x120] sm:$0xff] }
  0x26   :  { %811 = vmatpush3.bf16.msra.mxu0 %v810_v35  ;;  %v834_v11 = vpack.c.bf16 %v247_v9, %v246_v8  ;;  %v267_v12 = vld [vmem:[#allocation3 + $0x118] sm:$0xff]  ;;  %v269_v15 = vld [vmem:[#allocation3 + $0x128] sm:$0xf]  ;;  %vm844_vm4 = vmpackc.low %vm281_vm2, %vm910_vm3 }
  0x27   :  { %813 = vmatprep.subr.bf16.mxu0 %v812_v36  ;;  %838 = vmatpush3.bf16.msra.mxu1 %v837_v4  ;;  %v840_v13 = vpack.c.bf16 %v267_v12, %v266_v10  ;;  %v843_v16 = vpack.c.bf16 %v269_v15, %v268_v14  ;;  %v67_v20 = vld [vmem:[%s1123_s2] sm:$0x7]  ;;  %v427_v30 = vld [vmem:[%s1126_s5 + $0x8] sm:$0xff]  ;;  %v428_v39 = vld [vmem:[%s1126_s5 + $0x10] sm:$0xff] }
  0x28   :  { %839 = vmatprep.subr.bf16.mxu1 %v907_v1  ;;  %v72_v23 = vrot.slane %v67_v20, %v71_v19  ;;  %v76_v24 = vrot.slane %v67_v20, %v75_v21  ;;  %v80_v25 = vrot.slane %v67_v20, %v79_v22  ;;  %v426_v29 = vld [vmem:[%s1126_s5] sm:$0xff]  ;;  %v429_v40 = vld [vmem:[%s1126_s5 + $0x18] sm:$0xff]  ;;  %v431_v43 = vld [vmem:[%s1126_s5 + $0x28] sm:$0xff] }
  0x29   :  { %v847_v36 = vpack.c.bf16 %v427_v30, %v426_v29  ;;  %v432_v45 = vld [vmem:[%s1126_s5 + $0x30] sm:$0xff]  ;;  %v433_v46 = vld [vmem:[%s1126_s5 + $0x38] sm:$0xff]  ;;  %v435_v49 = vld [vmem:[%s1126_s5 + $0x48] sm:$0xff] }
  0x2a   :  { %815 = vmatpush3.bf16.msra.mxu0 %v814_v41  ;;  %v850_v41 = vpack.c.bf16 %v429_v40, %v428_v39  ;;  %v436_v51 = vld [vmem:[%s1126_s5 + $0x50] sm:$0xff]  ;;  %v437_v52 = vld [vmem:[%s1126_s5 + $0x58] sm:$0xff]  ;;  %v524_v55 = vld [vmem:[%s1128_s7] sm:$0xff] }
  0x2b   :  { %817 = vmatprep.subr.bf16.mxu0 %v816_v42  ;;  %841 = vmatpush3.bf16.msra.mxu1 %v840_v13  ;;  %v430_v42 = vld [vmem:[%s1126_s5 + $0x20] sm:$0xff]  ;;  %v525_v56 = vld [vmem:[%s1128_s7 + $0x8] sm:$0xff]  ;;  %v526_v4 = vld [vmem:[%s1128_s7 + $0x10] sm:$0xff] }
  0x2c   :  { %842 = vmatprep.subr.bf16.mxu1 %v907_v1  ;;  %v853_v44 = vpack.c.bf16 %v431_v43, %v430_v42  ;;  %v865_v57 = vpack.c.bf16 %v525_v56, %v524_v55  ;;  %vm869_vm8 = vmpackc.low %vm539_vm7, %vm910_vm3  ;;  %v650_v6 = vld [vmem:[%s1127_s6] ss:$0 sm:$0xff] }
  0x2d   :  { %v656_v15 = vld [vmem:[%s1130_s9] ss:$0 sm:$0xff] }
  0x2e   :  { %819 = vmatpush3.bf16.msra.mxu0 %v818_v47  ;;  %v856_v47 = vpack.c.bf16 %v433_v46, %v432_v45  ;;  %v657_v19 = vld [vmem:[#allocation2] ss:$0 sm:$0xff] }
  0x2f   :  { %821 = vmatprep.subr.bf16.mxu0 %v820_v48  ;;  %845 = vmatpush3.bf16.msk.msra.mxu1 %vm844_vm4, %v843_v16  ;;  %v434_v48 = vld [vmem:[%s1126_s5 + $0x40] sm:$0xff] }
  0x30   :  { %846 = vmatprep.subr.bf16.mxu1 %v907_v1  ;;  %v859_v50 = vpack.c.bf16 %v435_v49, %v434_v48 }
  0x32   :  { %823 = vmatpush3.bf16.msra.mxu0 %v822_v53  ;;  %v862_v53 = vpack.c.bf16 %v437_v52, %v436_v51 }
  0x33   :  { %825 = vmatprep.subr.bf16.mxu0 %v824_v54  ;;  %v438_v54 = vld [vmem:[%s1126_s5 + $0x60] sm:$0xf] }
  0x36   :  { %827 = vmatpush3.bf16.msra.mxu0 %v826_v59 }
  0x37   :  { %829 = vmatprep.subr.bf16.mxu0 %v828_v60  ;;  %v647_v60 = vld [vmem:[%s1125_s4] ss:$0 sm:$0xff] }
  0x3a   :  { %831 = vmatpush3.bf16.msra.mxu0 %v830_v0 }
  0x3b   :  { %833 = vmatprep.subr.bf16.mxu0 %v832_v7 }
  0x3e   :  { %835 = vmatpush3.bf16.msra.mxu0 %v834_v11  ;;  %v653_v11 = vld [vmem:[%s1129_s8] ss:$0 sm:$0xff] }
  0x3f   :  { %864 = vmatprep.subr.bf16.mxu0 %v907_v1 }
  0xf4   :  { %v154_v26 = vpop.f32.mrb[0].mxu0 }
  0xf5   :  { %v155_v27 = vadd.f32 %v154_v26, %v72_v23  ;;  %v156_v28 = vpop.f32.mrb[1].mxu0 }
  0xf6   :  { %v157_v31 = vadd.f32 %v156_v28, %v76_v24  ;;  %v225_v32 = vpop.f32.mrb[0].mxu1 }
  0xf7   :  { %v226_v33 = vadd.f32 %v225_v32, %v80_v25  ;;  %v734_v34 = vpop.f32.mrb[1].mxu1  ;;  %v229_v37 = vmax.f32 %v155_v27, 0.0 }
  0xf8   :  { %v230_v35 = vmax.f32 %v157_v31, 0.0 }
  0xf9   :  { %v231_v38 = vmax.f32 %v226_v33, 0.0 }
  0xfa   :  { %349 = vmatprep.mubr.f32.mxu0 %v230_v35 }
  0xfb   :  { %350 = vmatmul.mubr.f32.vlgmr.msra.gmra.mrb[2].mxu0 %v229_v37  ;;  %748 = vmatmul.mubr.msk.f32.vlgmr.msra.gmra.mrb[2].mxu1 %vm277_vm5, %v231_v38 }
  0xfc   :  { %848 = vmatpush3.bf16.msra.mxu1 %v847_v36  ;;  %776 = vmatprep.mubr.msk.f32.mxu1 %vm909_vm0, %v908_v2 }
  0xfd   :  { %849 = vmatprep.subr.bf16.mxu1 %v907_v1  ;;  %787 = vmatprep.mubr.msk.f32.mxu0 %vm909_vm0, %v908_v2 }
  0xfe   :  { %866 = vmatpush3.bf16.msra.mxu0 %v865_v57 }
  0xff   :  { %867 = vmatprep.subr.bf16.mxu0 %v907_v1 }
 0x100   :  { %851 = vmatpush3.bf16.msra.mxu1 %v850_v41 }
 0x101   :  { %852 = vmatprep.subr.bf16.mxu1 %v907_v1 }
 0x104   :  { %854 = vmatpush3.bf16.msra.mxu1 %v853_v44 }
 0x105   :  { %855 = vmatprep.subr.bf16.mxu1 %v907_v1 }
 0x108   :  { %857 = vmatpush3.bf16.msra.mxu1 %v856_v47 }
 0x109   :  { %858 = vmatprep.subr.bf16.mxu1 %v907_v1 }
 0x10c   :  { %860 = vmatpush3.bf16.msra.mxu1 %v859_v50 }
 0x10d   :  { %861 = vmatprep.subr.bf16.mxu1 %v907_v1  ;;  %v527_v1 = vld [vmem:[%s1128_s7 + $0x18] sm:$0x3f] }
 0x10e   :  { %v868_v5 = vpack.c.bf16 %v527_v1, %v526_v4 }
 0x110   :  { %863 = vmatpush3.bf16.msra.mxu1 %v862_v53  ;;  %870 = vmatpush3.bf16.msk.msra.mxu0 %vm869_vm8, %v868_v5 }
 0x111   :  { %774 = vmatprep.subr.mxu1 %v908_v2 }
 0x114   :  { %775 = vmatpush3.msk.msra.mxu1 %vm281_vm2, %v438_v54 }
 0x1ce   :  { %v695_v58 = vpop.f32.mrb[2].mxu0  ;;  %v421_v2 = vpop.f32.mrb[2].mxu1 }
 0x1cf   :  { %v696_v59 = vpop.f32.mrb[3].mxu0  ;;  %v749_v61 = vpop.f32.mrb[3].mxu1 }
 0x1d0   :  { %v697_v62 = vadd.f32 %v696_v59, %v695_v58 }
 0x1d2   :  { %v352_v63 = vadd.f32 %v697_v62, %v647_v60 }
 0x1d4   :  { %v422_v0 = vadd.f32 %v421_v2, %v352_v63 }
 0x1d6   :  { %v425_v3 = vmax.f32 %v422_v0, 0.0 }
 0x1d8   :  { %777 = vmatmul.mubr.msk.f32.vlgmr.msra.gmra.mrb[4].mxu1 %vm446_vm6, %v425_v3 }
 0x2ab   :  { %v519_v7 = vpop.f32.mrb[4].mxu1 }
 0x2ac   :  { %v520_v8 = vadd.f32 %v650_v6, %v519_v7  ;;  %v778_v9 = vpop.f32.mrb[5].mxu1 }
 0x2ae   :  { %v523_v10 = vmax.f32 %v520_v8, 0.0 }
 0x2b0   :  { %788 = vmatmul.mubr.msk.f32.vlgmr.msra.gmra.mrb[4].mxu0 %vm535_vm9, %v523_v10 }
 0x383   :  { %v609_v12 = vpop.f32.mrb[4].mxu0 }
 0x384   :  { %v610_v13 = vadd.f32 %v653_v11, %v609_v12  ;;  %v789_v14 = vpop.f32.mrb[5].mxu0 }
 0x386   :  { %v613_v16 = vmax.f32 %v610_v13, 0.0 }
 0x388   :  { %v621_v17 = vmul.f32 %v656_v15, %v613_v16 }
 0x38a   :  { %v623_v18 = vsel %vm622_vm10, %v621_v17, 0.0 }
 0x38b   :  { %624 = vadd.xlane.f32.xlu0 %v623_v18 }
 0x418   :  { %v625_v20 = vpop.xlane.xlu0 %624 }
 0x419   :  { %v633_v21 = vadd.f32 %v657_v19, %v625_v20 }
 0x41b   :  { %v634_v22 = vmul.f32 0.5, %v633_v21 }
 0x41d   :  { %878 = vtanh.f32 %v634_v22 }
 0x427   :  { %v879_v23 = vpop.eup %878 }
 0x428   :  { %v636_v24 = vadd.f32 1.0, %v879_v23 }
 0x42a   :  { %v637_v25 = vmul.f32 0.5, %v636_v24 }
 0x42c   :  { %639 = vst.msk [vmem:[%s1132_s11] sm:$0xff] %vm638_vm11, %v637_v25 }
 0x42d   :  { %644 = vsyncpa [#allocation4], 1 }

</bundles_post_ra>
